<compile_context>
chip_gen: v5e
topology: v5e:2x2
jax: 0.10.0
libtpu: 0.0.40
codegen_flags: <defaults>
</compile_context>

<pallas_src>
import jax
import jax.numpy as jnp
from jax.experimental import pallas as pl
from jax.experimental.pallas import tpu as pltpu

D_IN, D_H1, D_H2, D_OUT = 48, 64, 32, 1


def mlp_kernel(x_ref, w1_ref, b1_ref, w2_ref, b2_ref, w3_ref, b3_ref, o_ref):
    # All three layers on the MXU.  Inputs/weights arrive block-diag packed, so the
    # dots have (K, N) of (P*48, P*64), (P*64, P*32), (P*32, P) and the MXU lanes
    # stay filled.  ReLU / bias adds are plain VPU ops on the packed layout.
    x = x_ref[...]
    h1 = jnp.dot(x, w1_ref[...], preferred_element_type=jnp.float32) + b1_ref[...]
    h1 = jnp.maximum(h1, 0.0)
    h2 = jnp.dot(h1, w2_ref[...], preferred_element_type=jnp.float32) + b2_ref[...]
    h2 = jnp.maximum(h2, 0.0)
    out = jnp.dot(h2, w3_ref[...], preferred_element_type=jnp.float32) + b3_ref[...]
    o_ref[...] = out.astype(o_ref.dtype)


def _round_up(a, m):
    return ((a + m - 1) // m) * m


def _block_diag(w, p):
    """[k, n] -> [p*k, p*n] block-diagonal (p copies of w on the diagonal)."""
    k, n = w.shape
    eye = jnp.eye(p, dtype=w.dtype)
    return (eye[:, None, :, None] * w[None, :, None, :]).reshape(p * k, p * n)


def _tpu_kind():
    try:
        return jax.devices()[0].device_kind.lower()
    except Exception:
        return ""


def curvefit_forward(x, params, *, tb=8192, pack=None):
    """x: [B, 48] float32.  params: w1,b1,w2,b2,w3,b3 with weights stored [in, out]."""
    B = x.shape[0]
    kind = _tpu_kind()
    if pack is None:
        # 2x packing on 128-wide MXUs (v2-v5), 4x on 256-wide MXUs (v6e/v7x+).
        pack = 2 if any(v in kind for v in ("v2", "v3", "v4", "v5")) else 4
    two_tc = ("v7" in kind) or ("7x" in kind)

    w1, b1 = params["w1"], params["b1"]
    w2, b2 = params["w2"], params["b2"]
    w3, b3 = params["w3"], params["b3"]

    # Block-diagonal packed weights / tiled biases (tiny; built once at XLA level).
    w1_bd = _block_diag(w1, pack)            # [P*48, P*64]
    w2_bd = _block_diag(w2, pack)            # [P*64, P*32]
    w3_bd = _block_diag(w3, pack)            # [P*32, P]
    b1_bd = jnp.tile(b1, (1, pack))          # [1, P*64]
    b2_bd = jnp.tile(b2, (1, pack))          # [1, P*32]
    b3_bd = jnp.tile(b3, (1, pack))          # [1, P]

    # --- batch tiling (in packed rows) ---
    bp = pl.cdiv(B, pack)                    # packed rows needed
    bp8 = _round_up(bp, 8)                   # sublane multiple
    tbp = max(8, _round_up(max(tb, pack) // pack, 8))  # requested packed-row tile
    n_tiles = pl.cdiv(bp8, tbp)
    if two_tc and bp8 >= 16:
        # Keep the grid >= 2 and even so the "parallel" axis shards across both TCs.
        n_tiles = max(2, n_tiles)
        n_tiles += n_tiles % 2
    # Balanced tiles: split bp8 as evenly as possible, then round up to sublanes.
    tile = _round_up(pl.cdiv(bp8, n_tiles), 8)
    bp_full = n_tiles * tile
    b_full = bp_full * pack

    if b_full != B:
        x = jnp.pad(x, ((0, b_full - B), (0, 0)))
    x_packed = x.reshape(bp_full, pack * D_IN)   # free row-major reshape

    out = pl.pallas_call(
        mlp_kernel,
        out_shape=jax.ShapeDtypeStruct((bp_full, pack), jnp.float32),
        grid_spec=pltpu.PrefetchScalarGridSpec(
            num_scalar_prefetch=0,
            grid=(n_tiles,),
            in_specs=[
                pl.BlockSpec((tile, pack * D_IN), lambda i: (i, 0)),         # x (streamed)
                pl.BlockSpec((pack * D_IN, pack * D_H1), lambda i: (0, 0)),  # w1 (resident)
                pl.BlockSpec((1, pack * D_H1), lambda i: (0, 0)),            # b1
                pl.BlockSpec((pack * D_H1, pack * D_H2), lambda i: (0, 0)),  # w2
                pl.BlockSpec((1, pack * D_H2), lambda i: (0, 0)),            # b2
                pl.BlockSpec((pack * D_H2, pack), lambda i: (0, 0)),         # w3
                pl.BlockSpec((1, pack), lambda i: (0, 0)),                   # b3
            ],
            out_specs=pl.BlockSpec((tile, pack), lambda i: (i, 0)),
        ),
        compiler_params=pltpu.CompilerParams(
            dimension_semantics=("parallel",),
        ),
    )(x_packed, w1_bd, b1_bd, w2_bd, b2_bd, w3_bd, b3_bd)

    # [bp_full, P] -> [b_full, 1] row-major (packed (r, j) == original row P*r + j).
    return out.reshape(b_full, D_OUT)[:B]


def init_params(key):
    """Deterministic init mirroring nn.Linear shapes (weights stored as [in, out])."""
    k1, k2, k3, k4, k5, k6 = jax.random.split(key, 6)

    def uinit(k, fan_in, shape):
        bound = 1.0 / jnp.sqrt(fan_in)
        return jax.random.uniform(k, shape, jnp.float32, -bound, bound)

    return {
        "w1": uinit(k1, D_IN, (D_IN, D_H1)),
        "b1": uinit(k2, D_IN, (1, D_H1)),
        "w2": uinit(k3, D_H1, (D_H1, D_H2)),
        "b2": uinit(k4, D_H1, (1, D_H2)),
        "w3": uinit(k5, D_H2, (D_H2, D_OUT)),
        "b3": uinit(k6, D_H2, (1, D_OUT)),
    }


def reference_forward(x, p):
    hp = jax.lax.Precision.HIGHEST
    h1 = jnp.maximum(jnp.dot(x, p["w1"], precision=hp) + p["b1"], 0.0)
    h2 = jnp.maximum(jnp.dot(h1, p["w2"], precision=hp) + p["b2"], 0.0)
    return jnp.dot(h2, p["w3"], precision=hp) + p["b3"]


if __name__ == "__main__":
    key = jax.random.PRNGKey(0)
    kx, kp = jax.random.split(key)
    params = init_params(kp)

    # Small batches: exact-multiple and ragged cases exercising pack + sublane padding.
    for B in (2, 8, 10, 50):
        x = jax.random.normal(jax.random.fold_in(kx, B), (B, D_IN), jnp.float32)
        out = jax.block_until_ready(curvefit_forward(x, params))
        ref = reference_forward(x, params)
        assert out.shape == (B, D_OUT), out.shape
        assert bool(jnp.all(jnp.isfinite(out)))
        # Tolerance intentionally 1e-3: the kernel keeps Mosaic's default f32 matmul
        # lowering (explicit perf/precision decision) while the reference uses
        # Precision.HIGHEST.
        assert jnp.allclose(out, ref, atol=1e-3, rtol=1e-3), float(
            jnp.max(jnp.abs(out - ref))
        )
    print("KERNEL_OK")
</pallas_src>

<mosaic_0001>
module attributes {stable_mosaic.version = 11 : i64} {
  func.func @mlp_kernel(%arg0: i32, %arg1: memref<8x192xf32, #tpu.memory_space<vmem>>, %arg2: memref<192x256xf32, #tpu.memory_space<vmem>>, %arg3: memref<1x256xf32, #tpu.memory_space<vmem>>, %arg4: memref<256x128xf32, #tpu.memory_space<vmem>>, %arg5: memref<1x128xf32, #tpu.memory_space<vmem>>, %arg6: memref<128x4xf32, #tpu.memory_space<vmem>>, %arg7: memref<1x4xf32, #tpu.memory_space<vmem>>, %arg8: memref<8x4xf32, #tpu.memory_space<vmem>>) attributes {dimension_semantics = [#tpu.dimension_semantics<parallel>], iteration_bounds = array<i64: 1>, scalar_prefetch = 0 : i64, scratch_operands = 0 : i64, tpu.core_type = #tpu.core_type<tc>, window_params = [{transform_indices = @transform_0, window_bounds = array<i64: 8, 192>}, {pipeline_mode = #tpu.pipeline_mode<synchronous>, transform_indices = @transform_1, window_bounds = array<i64: 192, 256>}, {pipeline_mode = #tpu.pipeline_mode<synchronous>, transform_indices = @transform_2, window_bounds = array<i64: 1, 256>}, {pipeline_mode = #tpu.pipeline_mode<synchronous>, transform_indices = @transform_3, window_bounds = array<i64: 256, 128>}, {pipeline_mode = #tpu.pipeline_mode<synchronous>, transform_indices = @transform_4, window_bounds = array<i64: 1, 128>}, {pipeline_mode = #tpu.pipeline_mode<synchronous>, transform_indices = @transform_5, window_bounds = array<i64: 128, 4>}, {pipeline_mode = #tpu.pipeline_mode<synchronous>, transform_indices = @transform_6, window_bounds = array<i64: 1, 4>}, {transform_indices = @transform_7, window_bounds = array<i64: 8, 4>}]} {
    %c0 = arith.constant 0 : index
    %c0_0 = arith.constant 0 : index
    %0 = vector.load %arg1[%c0, %c0_0] : memref<8x192xf32, #tpu.memory_space<vmem>>, vector<8x192xf32>
    %c0_1 = arith.constant 0 : index
    %c0_2 = arith.constant 0 : index
    %1 = vector.load %arg2[%c0_1, %c0_2] : memref<192x256xf32, #tpu.memory_space<vmem>>, vector<192x256xf32>
    %cst = arith.constant dense<0.000000e+00> : vector<8x256xf32>
    %2 = tpu.matmul %0, %1, %cst {dimension_numbers = #tpu.dot_dimension_numbers<[1], [0], [0], [1], [0, 0, 1, 1], [], []>} : vector<8x192xf32>, vector<192x256xf32>, vector<8x256xf32> -> vector<8x256xf32>
    %c0_3 = arith.constant 0 : index
    %c0_4 = arith.constant 0 : index
    %3 = vector.load %arg3[%c0_3, %c0_4] : memref<1x256xf32, #tpu.memory_space<vmem>>, vector<1x256xf32>
    %4 = vector.broadcast %3 : vector<1x256xf32> to vector<8x256xf32>
    %5 = arith.addf %2, %4 : vector<8x256xf32>
    %cst_5 = arith.constant 0.000000e+00 : f32
    %6 = vector.broadcast %cst_5 : f32 to vector<8x256xf32>
    %7 = arith.maximumf %5, %6 : vector<8x256xf32>
    %c0_6 = arith.constant 0 : index
    %c0_7 = arith.constant 0 : index
    %8 = vector.load %arg4[%c0_6, %c0_7] : memref<256x128xf32, #tpu.memory_space<vmem>>, vector<256x128xf32>
    %cst_8 = arith.constant dense<0.000000e+00> : vector<8x128xf32>
    %9 = tpu.matmul %7, %8, %cst_8 {dimension_numbers = #tpu.dot_dimension_numbers<[1], [0], [0], [1], [0, 0, 1, 1], [], []>} : vector<8x256xf32>, vector<256x128xf32>, vector<8x128xf32> -> vector<8x128xf32>
    %c0_9 = arith.constant 0 : index
    %c0_10 = arith.constant 0 : index
    %10 = vector.load %arg5[%c0_9, %c0_10] : memref<1x128xf32, #tpu.memory_space<vmem>>, vector<1x128xf32>
    %11 = vector.broadcast %10 : vector<1x128xf32> to vector<8x128xf32>
    %12 = arith.addf %9, %11 : vector<8x128xf32>
    %cst_11 = arith.constant 0.000000e+00 : f32
    %13 = vector.broadcast %cst_11 : f32 to vector<8x128xf32>
    %14 = arith.maximumf %12, %13 : vector<8x128xf32>
    %c0_12 = arith.constant 0 : index
    %c0_13 = arith.constant 0 : index
    %15 = vector.load %arg6[%c0_12, %c0_13] : memref<128x4xf32, #tpu.memory_space<vmem>>, vector<128x4xf32>
    %cst_14 = arith.constant dense<0.000000e+00> : vector<8x4xf32>
    %16 = tpu.matmul %14, %15, %cst_14 {dimension_numbers = #tpu.dot_dimension_numbers<[1], [0], [0], [1], [0, 0, 1, 1], [], []>} : vector<8x128xf32>, vector<128x4xf32>, vector<8x4xf32> -> vector<8x4xf32>
    %c0_15 = arith.constant 0 : index
    %c0_16 = arith.constant 0 : index
    %17 = vector.load %arg7[%c0_15, %c0_16] : memref<1x4xf32, #tpu.memory_space<vmem>>, vector<1x4xf32>
    %18 = vector.broadcast %17 : vector<1x4xf32> to vector<8x4xf32>
    %19 = arith.addf %16, %18 : vector<8x4xf32>
    %c0_17 = arith.constant 0 : index
    %c0_18 = arith.constant 0 : index
    %20 = vector.load %arg8[%c0_17, %c0_18] : memref<8x4xf32, #tpu.memory_space<vmem>>, vector<8x4xf32>
    tpu.vector_store %arg8[%c0_17, %c0_18], %19 {strides = array<i32>} : memref<8x4xf32, #tpu.memory_space<vmem>>, vector<8x4xf32>,
    return
  }
  func.func @transform_0(%arg0: i32) -> (i32, i32) {
    %c0_i32 = arith.constant 0 : i32
    %c0_i32_0 = arith.constant 0 : i32
    return %arg0, %c0_i32 : i32, i32
  }
  func.func @transform_1(%arg0: i32) -> (i32, i32) {
    %c0_i32 = arith.constant 0 : i32
    %c0_i32_0 = arith.constant 0 : i32
    %c0_i32_1 = arith.constant 0 : i32
    return %c0_i32, %c0_i32_0 : i32, i32
  }
  func.func @transform_2(%arg0: i32) -> (i32, i32) {
    %c0_i32 = arith.constant 0 : i32
    %c0_i32_0 = arith.constant 0 : i32
    %c0_i32_1 = arith.constant 0 : i32
    return %c0_i32, %c0_i32_0 : i32, i32
  }
  func.func @transform_3(%arg0: i32) -> (i32, i32) {
    %c0_i32 = arith.constant 0 : i32
    %c0_i32_0 = arith.constant 0 : i32
    %c0_i32_1 = arith.constant 0 : i32
    return %c0_i32, %c0_i32_0 : i32, i32
  }
  func.func @transform_4(%arg0: i32) -> (i32, i32) {
    %c0_i32 = arith.constant 0 : i32
    %c0_i32_0 = arith.constant 0 : i32
    %c0_i32_1 = arith.constant 0 : i32
    return %c0_i32, %c0_i32_0 : i32, i32
  }
  func.func @transform_5(%arg0: i32) -> (i32, i32) {
    %c0_i32 = arith.constant 0 : i32
    %c0_i32_0 = arith.constant 0 : i32
    %c0_i32_1 = arith.constant 0 : i32
    return %c0_i32, %c0_i32_0 : i32, i32
  }
  func.func @transform_6(%arg0: i32) -> (i32, i32) {
    %c0_i32 = arith.constant 0 : i32
    %c0_i32_0 = arith.constant 0 : i32
    %c0_i32_1 = arith.constant 0 : i32
    return %c0_i32, %c0_i32_0 : i32, i32
  }
  func.func @transform_7(%arg0: i32) -> (i32, i32) {
    %c0_i32 = arith.constant 0 : i32
    %c0_i32_0 = arith.constant 0 : i32
    return %arg0, %c0_i32 : i32, i32
  }
}

</mosaic_0001>

<bundles_post_ra>
// kernel: tpu_custom_call.1
= control target key start
LH: loop header
LB: loop body
LE: loop exit
PB: predicated region body
PF: predicated region fallthrough
CT: control target
= control target key end

     0   :  { %12 = vsyncpa [#allocation3], 0  ;;  %s507_s0 = inlined_call_operand.vmem [shape: f32[8,192], index: 0, kind: input, shape index: {}]   ;;  %s508_s1 = inlined_call_operand.hbm [shape: f32[192,256], index: 1, kind: input, shape index: {}]   ;;  %s509_s2 = inlined_call_operand.vmem [shape: f32[1,256], index: 2, kind: input, shape index: {}]   ;;  %s510_s3 = inlined_call_operand.hbm [shape: f32[256,128], index: 3, kind: input, shape index: {}]   ;;  %s511_s4 = inlined_call_operand.vmem [shape: f32[1,128], index: 4, kind: input, shape index: {}]   ;;  %s512_s5 = inlined_call_operand.vmem [shape: f32[128,4], index: 5, kind: input, shape index: {}]   ;;  %s513_s6 = inlined_call_operand.vmem [shape: f32[1,4], index: 6, kind: input, shape index: {}]   ;;  %s514_s7 = inlined_call_operand.vmem [shape: f32[8,4], index: 7, kind: output, shape index: {}]  }
   0x1   :  { %s20_s26 = sshll.u32 %s508_s1, 4  ;;  %s21_s26 = int_to_ptr.hbm [resolvable:$true] %s20_s26 }
   0x2   :  { %13 = vsyncpa [#allocation5], 0  ;;  %s387_s27 = smov [#allocation2]   ;;  %s35_s8 = sshll.u32 %s510_s3, 4  ;;  %s36_s8 = int_to_ptr.hbm [resolvable:$true] %s35_s8 }
   0x3   :  { %s22_s28 = sshll.u32 %s387_s27, 4  ;;  %s388_s9 = smov 256   ;;  %s23_s28 = int_to_ptr.vmem [resolvable:$true] %s22_s28 }
   0x4   :  { %s389_s10 = smov 16   ;;  %s390_s11 = smov [#allocation4]  }
   0x5   :  { %28 = dma.hbm_to_vmem [thread:$0]  %s21_s26, 6144, %s23_s28, [#allocation3], %s388_s9, %s388_s9, %s389_s10  }
   0x6   :  { %s37_s12 = sshll.u32 %s390_s11, 4  ;;  %s391_s13 = smov 128   ;;  %s38_s12 = int_to_ptr.vmem [resolvable:$true] %s37_s12 }
   0x7   :  { %s392_s14 = smov 8  }
   0x8   :  { %43 = dma.hbm_to_vmem [thread:$0]  %s36_s8, 4096, %s38_s12, [#allocation5], %s391_s13, %s391_s13, %s392_s14  }
   0x9   :  { %383 = dma.done.wait [#allocation3], 6144  }
   0xa   :  { %384 = vsyncadd [#allocation3], 4294961152 }
   0xb   :  { %385 = dma.done.wait [#allocation5], 4096  }
   0xc   :  { %386 = vsyncadd [#allocation5], 4294963200  ;;  %v91_v0 = vld [vmem:[#allocation2 + $0xf8] sm:$0xff]  ;;  %v89_v1 = vld [vmem:[#allocation2 + $0xe8] sm:$0xff]  ;;  %vm114_vm0 = vcmask 523264   ;;  %vm317_vm1 = vcmask 31744  }
   0xd   :  { %158 = vmatpush.msra.mxu2 %v91_v0  ;;  %v90_v2 = vld [vmem:[#allocation2 + $0xf0] sm:$0xff]  ;;  %v87_v3 = vld [vmem:[#allocation2 + $0xd8] sm:$0xff]  ;;  %v88_v4 = vld [vmem:[#allocation2 + $0xe0] sm:$0xff] }
   0xe   :  { %118 = vmatpush.msra.mxu0 %v90_v2  ;;  %v86_v5 = vld [vmem:[#allocation2 + $0xd0] sm:$0xff]  ;;  %v85_v6 = vld [vmem:[#allocation2 + $0xc8] sm:$0xff]  ;;  %v84_v7 = vld [vmem:[#allocation2 + $0xc0] sm:$0xff] }
   0xf   :  { %159 = vmatpush.msra.mxu2 %v89_v1  ;;  %v107_v8 = vld [vmem:[#allocation2 + $0x178] sm:$0xff]  ;;  %v105_v10 = vld [vmem:[#allocation2 + $0x168] sm:$0xff]  ;;  %v82_v11 = vld [vmem:[#allocation2 + $0xb0] sm:$0xff] }
  0x10   :  { %119 = vmatpush.msra.mxu0 %v88_v4  ;;  %v83_v9 = vld [vmem:[#allocation2 + $0xb8] sm:$0xff]  ;;  %186 = vmatpush.msra.mxu3 %v107_v8  ;;  %v81_v13 = vld [vmem:[#allocation2 + $0xa8] sm:$0xff]  ;;  %v80_v14 = vld [vmem:[#allocation2 + $0xa0] sm:$0xff] }
  0x11   :  { %160 = vmatpush.msra.mxu2 %v87_v3  ;;  %v103_v12 = vld [vmem:[#allocation2 + $0x158] sm:$0xff]  ;;  %v101_v15 = vld [vmem:[#allocation2 + $0x148] sm:$0xff]  ;;  %v106_v16 = vld [vmem:[#allocation2 + $0x170] sm:$0xff] }
  0x12   :  { %120 = vmatpush.msra.mxu0 %v86_v5  ;;  %187 = vmatpush.msra.mxu3 %v105_v10  ;;  %v79_v17 = vld [vmem:[#allocation2 + $0x98] sm:$0xff]  ;;  %v78_v18 = vld [vmem:[#allocation2 + $0x90] sm:$0xff]  ;;  %v104_v20 = vld [vmem:[#allocation2 + $0x160] sm:$0xff] }
  0x13   :  { %161 = vmatpush.msra.mxu2 %v85_v6  ;;  %v99_v19 = vld [vmem:[#allocation2 + $0x138] sm:$0xff]  ;;  %146 = vmatpush.msra.mxu1 %v106_v16  ;;  %v77_v21 = vld [vmem:[#allocation2 + $0x88] sm:$0xff]  ;;  %v102_v22 = vld [vmem:[#allocation2 + $0x150] sm:$0xff] }
  0x14   :  { %121 = vmatpush.msra.mxu0 %v84_v7  ;;  %188 = vmatpush.msra.mxu3 %v103_v12  ;;  %v76_v23 = vld [vmem:[#allocation2 + $0x80] sm:$0xff]  ;;  %v97_v24 = vld [vmem:[#allocation2 + $0x128] sm:$0xff]  ;;  %v75_v25 = vld [vmem:[#allocation2 + $0x78] sm:$0xff] }
  0x15   :  { %162 = vmatpush.msra.mxu2 %v83_v9  ;;  %147 = vmatpush.msra.mxu1 %v104_v20  ;;  %v100_v26 = vld [vmem:[#allocation2 + $0x140] sm:$0xff]  ;;  %v74_v27 = vld [vmem:[#allocation2 + $0x70] sm:$0xff]  ;;  %v95_v28 = vld [vmem:[#allocation2 + $0x118] sm:$0xff] }
  0x16   :  { %122 = vmatpush.msra.mxu0 %v82_v11  ;;  %189 = vmatpush.msra.mxu3 %v101_v15  ;;  %v73_v29 = vld [vmem:[#allocation2 + $0x68] sm:$0xff]  ;;  %v98_v30 = vld [vmem:[#allocation2 + $0x130] sm:$0xff]  ;;  %v72_v31 = vld [vmem:[#allocation2 + $0x60] sm:$0xff] }
  0x17   :  { %163 = vmatpush.msra.mxu2 %v81_v13  ;;  %148 = vmatpush.msra.mxu1 %v102_v22  ;;  %v93_v32 = vld [vmem:[#allocation2 + $0x108] sm:$0xff]  ;;  %v71_v33 = vld [vmem:[#allocation2 + $0x58] sm:$0xff]  ;;  %v70_v35 = vld [vmem:[#allocation2 + $0x50] sm:$0xff] }
  0x18   :  { %123 = vmatpush.msra.mxu0 %v80_v14  ;;  %190 = vmatpush.msra.mxu3 %v99_v19  ;;  %v59_v34 = vld [vmem:[%s507_s0 + $0x8] sm:$0xff]  ;;  %v96_v36 = vld [vmem:[#allocation2 + $0x120] sm:$0xff]  ;;  %v231_v38 = vld [vmem:[#allocation4 + $0xf8] sm:$0xff] }
  0x19   :  { %164 = vmatpush.msra.mxu2 %v79_v17  ;;  %149 = vmatpush.msra.mxu1 %v100_v26  ;;  %v69_v37 = vld [vmem:[#allocation2 + $0x48] sm:$0xff]  ;;  %v68_v39 = vld [vmem:[#allocation2 + $0x40] sm:$0xff]  ;;  %v94_v40 = vld [vmem:[#allocation2 + $0x110] sm:$0xff] }
  0x1a   :  { %124 = vmatpush.msra.mxu0 %v78_v18  ;;  %191 = vmatpush.msra.mxu3 %v97_v24  ;;  %v67_v41 = vld [vmem:[#allocation2 + $0x38] sm:$0xff]  ;;  %v230_v42 = vld [vmem:[#allocation4 + $0xf0] sm:$0xff]  ;;  %v92_v44 = vld [vmem:[#allocation2 + $0x100] sm:$0xff] }
  0x1b   :  { %165 = vmatpush.msra.mxu2 %v77_v21  ;;  %150 = vmatpush.msra.mxu1 %v98_v30  ;;  %v66_v43 = vld [vmem:[#allocation2 + $0x30] sm:$0xff]  ;;  %v65_v45 = vld [vmem:[#allocation2 + $0x28] sm:$0xff]  ;;  %v64_v46 = vld [vmem:[#allocation2 + $0x20] sm:$0xff] }
  0x1c   :  { %125 = vmatpush.msra.mxu0 %v76_v23  ;;  %192 = vmatpush.msra.mxu3 %v95_v28  ;;  %v215_v47 = vld [vmem:[#allocation4 + $0x78] sm:$0xff]  ;;  %v229_v49 = vld [vmem:[#allocation4 + $0xe8] sm:$0xff]  ;;  %v62_v50 = vld [vmem:[#allocation2 + $0x10] sm:$0xff] }
  0x1d   :  { %166 = vmatpush.msra.mxu2 %v75_v25  ;;  %151 = vmatpush.msra.mxu1 %v96_v36  ;;  %v63_v48 = vld [vmem:[#allocation2 + $0x18] sm:$0xff]  ;;  %v214_v51 = vld [vmem:[#allocation4 + $0x70] sm:$0xff]  ;;  %v61_v52 = vld [vmem:[#allocation2 + $0x8] sm:$0xff] }
  0x1e   :  { %126 = vmatpush.msra.mxu0 %v74_v27  ;;  %193 = vmatpush.msra.mxu3 %v93_v32  ;;  %v228_v53 = vld [vmem:[#allocation4 + $0xe0] sm:$0xff]  ;;  %v213_v56 = vld [vmem:[#allocation4 + $0x68] sm:$0xff]  ;;  %v227_v57 = vld [vmem:[#allocation4 + $0xd8] sm:$0xff] }
  0x1f   :  { %167 = vmatpush.msra.mxu2 %v73_v29  ;;  %326 = vmatmul.msk.f32.vlgmr.msra.gmra.mxu3 %vm114_vm0, %v59_v34  ;;  %v58_v54 = vld [vmem:[%s507_s0] sm:$0xff]  ;;  %v226_v59 = vld [vmem:[#allocation4 + $0xd0] sm:$0xff]  ;;  %v211_v60 = vld [vmem:[#allocation4 + $0x58] sm:$0xff] }
  0x20   :  { %127 = vmatpush.msra.mxu0 %v72_v31  ;;  %256 = vmatpush.msrb.mxu3 %v231_v38  ;;  %v60_v55 = vld [vmem:[#allocation2] sm:$0xff]  ;;  %v225_v61 = vld [vmem:[#allocation4 + $0xc8] sm:$0xff]  ;;  %v210_v62 = vld [vmem:[#allocation4 + $0x50] sm:$0xff] }
  0x21   :  { %168 = vmatpush.msra.mxu2 %v71_v33  ;;  %152 = vmatpush.msra.mxu1 %v94_v40  ;;  %v212_v58 = vld [vmem:[#allocation4 + $0x60] sm:$0xff]  ;;  %v209_v0 = vld [vmem:[#allocation4 + $0x48] sm:$0xff]  ;;  %v223_v1 = vld [vmem:[#allocation4 + $0xb8] sm:$0xff] }
  0x22   :  { %128 = vmatpush.msra.mxu0 %v70_v35  ;;  %257 = vmatpush.msrb.mxu3 %v230_v42  ;;  %v224_v63 = vld [vmem:[#allocation4 + $0xc0] sm:$0xff]  ;;  %v222_v3 = vld [vmem:[#allocation4 + $0xb0] sm:$0xff]  ;;  %v207_v4 = vld [vmem:[#allocation4 + $0x38] sm:$0xff] }
  0x23   :  { %169 = vmatpush.msra.mxu2 %v69_v37  ;;  %153 = vmatpush.msra.mxu1 %v92_v44  ;;  %v208_v2 = vld [vmem:[#allocation4 + $0x40] sm:$0xff]  ;;  %v221_v5 = vld [vmem:[#allocation4 + $0xa8] sm:$0xff]  ;;  %v206_v6 = vld [vmem:[#allocation4 + $0x30] sm:$0xff] }
  0x24   :  { %129 = vmatpush.msra.mxu0 %v68_v39  ;;  %325 = vmatmul.msk.f32.vlgmr.msra.gmra.mxu1 %vm114_vm0, %v59_v34  ;;  %v220_v7 = vld [vmem:[#allocation4 + $0xa0] sm:$0xff]  ;;  %v205_v8 = vld [vmem:[#allocation4 + $0x28] sm:$0xff]  ;;  %v219_v9 = vld [vmem:[#allocation4 + $0x98] sm:$0xff] }
  0x25   :  { %170 = vmatpush.msra.mxu2 %v67_v41  ;;  %236 = vmatpush.msrb.mxu1 %v215_v47  ;;  %v204_v10 = vld [vmem:[#allocation4 + $0x20] sm:$0xff]  ;;  %v218_v11 = vld [vmem:[#allocation4 + $0x90] sm:$0xff]  ;;  %v203_v12 = vld [vmem:[#allocation4 + $0x18] sm:$0xff] }
  0x26   :  { %130 = vmatpush.msra.mxu0 %v66_v43  ;;  %258 = vmatpush.msrb.mxu3 %v229_v49  ;;  %v217_v13 = vld [vmem:[#allocation4 + $0x88] sm:$0xff]  ;;  %v202_v14 = vld [vmem:[#allocation4 + $0x10] sm:$0xff]  ;;  %v216_v15 = vld [vmem:[#allocation4 + $0x80] sm:$0xff] }
  0x27   :  { %171 = vmatpush.msra.mxu2 %v65_v45  ;;  %237 = vmatpush.msrb.mxu1 %v214_v51  ;;  %v201_v16 = vld [vmem:[#allocation4 + $0x8] sm:$0xff]  ;;  %v200_v17 = vld [vmem:[#allocation4] sm:$0xff]  ;;  %v292_v18 = vld [vmem:[%s512_s5 + $0x78] sm:$0xff] }
  0x28   :  { %131 = vmatpush.msra.mxu0 %v64_v46  ;;  %259 = vmatpush.msrb.mxu3 %v228_v53  ;;  %v291_v19 = vld [vmem:[%s512_s5 + $0x70] sm:$0xff]  ;;  %v290_v20 = vld [vmem:[%s512_s5 + $0x68] sm:$0xff]  ;;  %v289_v21 = vld [vmem:[%s512_s5 + $0x60] sm:$0xff] }
  0x29   :  { %172 = vmatpush.msra.mxu2 %v63_v48  ;;  %238 = vmatpush.msrb.mxu1 %v213_v56  ;;  %v288_v22 = vld [vmem:[%s512_s5 + $0x58] sm:$0xff]  ;;  %v287_v23 = vld [vmem:[%s512_s5 + $0x50] sm:$0xff]  ;;  %v286_v24 = vld [vmem:[%s512_s5 + $0x48] sm:$0xff] }
  0x2a   :  { %132 = vmatpush.msra.mxu0 %v62_v50  ;;  %260 = vmatpush.msrb.mxu3 %v227_v57  ;;  %v285_v25 = vld [vmem:[%s512_s5 + $0x40] sm:$0xff]  ;;  %v284_v26 = vld [vmem:[%s512_s5 + $0x38] sm:$0xff]  ;;  %v283_v28 = vld [vmem:[%s512_s5 + $0x30] sm:$0xff] }
  0x2b   :  { %173 = vmatpush.msra.mxu2 %v61_v52  ;;  %239 = vmatpush.msrb.mxu1 %v212_v58  ;;  %v108_v27 = vld [vmem:[%s509_s2] sm:$0x3]  ;;  %v282_v30 = vld [vmem:[%s512_s5 + $0x28] sm:$0xff]  ;;  %v280_v43 = vld [vmem:[%s512_s5 + $0x18] sm:$0xff] }
  0x2c   :  { %174 = vmatmul.f32.vlgmr.msra.gmra.mxu2 %v58_v54  ;;  %133 = vmatpush.msra.mxu0 %v60_v55  ;;  %v110_v29 = vperm.slane %v108_v27, 0  ;;  %v281_v33 = vld [vmem:[%s512_s5 + $0x20] sm:$0xff]  ;;  %v111_v35 = vperm.slane %v108_v27, 1  ;;  %v279_v44 = vld [vmem:[%s512_s5 + $0x10] sm:$0xff]  ;;  %v278_v45 = vld [vmem:[%s512_s5 + $0x8] sm:$0xff] }
  0x2d   :  { %134 = vmatmul.f32.vlgmr.msra.gmra.mxu0 %v58_v54  ;;  %261 = vmatpush.msrb.mxu3 %v226_v59  ;;  %v277_v46 = vld [vmem:[%s512_s5] sm:$0xff] }
  0x2e   :  { %240 = vmatpush.msrb.mxu1 %v211_v60  ;;  %297 = vmatpush.msrb.mxu0 %v292_v18  ;;  %v333_v47 = vld [vmem:[%s511_s4] ss:$0 sm:$0xff] }
  0x2f   :  { %262 = vmatpush.msrb.mxu3 %v225_v61  ;;  %v334_v53 = vld [vmem:[%s513_s6] ss:$0 sm:$0xff] }
  0x30   :  { %241 = vmatpush.msrb.mxu1 %v210_v62  ;;  %298 = vmatpush.msrb.mxu0 %v291_v19 }
  0x31   :  { %263 = vmatpush.msrb.mxu3 %v224_v63 }
  0x32   :  { %242 = vmatpush.msrb.mxu1 %v209_v0  ;;  %299 = vmatpush.msrb.mxu0 %v290_v20 }
  0x33   :  { %264 = vmatpush.msrb.mxu3 %v223_v1 }
  0x34   :  { %243 = vmatpush.msrb.mxu1 %v208_v2  ;;  %300 = vmatpush.msrb.mxu0 %v289_v21 }
  0x35   :  { %265 = vmatpush.msrb.mxu3 %v222_v3 }
  0x36   :  { %244 = vmatpush.msrb.mxu1 %v207_v4  ;;  %301 = vmatpush.msrb.mxu0 %v288_v22 }
  0x37   :  { %266 = vmatpush.msrb.mxu3 %v221_v5 }
  0x38   :  { %245 = vmatpush.msrb.mxu1 %v206_v6  ;;  %302 = vmatpush.msrb.mxu0 %v287_v23 }
  0x39   :  { %267 = vmatpush.msrb.mxu3 %v220_v7 }
  0x3a   :  { %246 = vmatpush.msrb.mxu1 %v205_v8  ;;  %303 = vmatpush.msrb.mxu0 %v286_v24 }
  0x3b   :  { %268 = vmatpush.msrb.mxu3 %v219_v9 }
  0x3c   :  { %247 = vmatpush.msrb.mxu1 %v204_v10  ;;  %304 = vmatpush.msrb.mxu0 %v285_v25 }
  0x3d   :  { %269 = vmatpush.msrb.mxu3 %v218_v11 }
  0x3e   :  { %248 = vmatpush.msrb.mxu1 %v203_v12  ;;  %305 = vmatpush.msrb.mxu0 %v284_v26 }
  0x3f   :  { %270 = vmatpush.msrb.mxu3 %v217_v13 }
  0x40   :  { %249 = vmatpush.msrb.mxu1 %v202_v14  ;;  %306 = vmatpush.msrb.mxu0 %v283_v28 }
  0x41   :  { %271 = vmatpush.msrb.mxu3 %v216_v15 }
  0x42   :  { %250 = vmatpush.msrb.mxu1 %v201_v16  ;;  %307 = vmatpush.msrb.mxu0 %v282_v30 }
  0x44   :  { %251 = vmatpush.msrb.mxu1 %v200_v17  ;;  %308 = vmatpush.msrb.mxu0 %v281_v33 }
  0x46   :  { %309 = vmatpush.msrb.mxu0 %v280_v43 }
  0x48   :  { %310 = vmatpush.msrb.mxu0 %v279_v44 }
  0x4a   :  { %311 = vmatpush.msrb.mxu0 %v278_v45 }
  0x4c   :  { %312 = vmatpush.msrb.mxu0 %v277_v46 }
  0xa1   :  { %v155_v32 = vpop.f32.mrf.mxu1 }
  0xa2   :  { %v195_v38 = vpop.f32.mrf.mxu3 }
  0xaa   :  { %v135_v31 = vpop.f32.mrf.mxu0 }
  0xab   :  { %v136_v34 = vadd.f32 %v135_v31, %v110_v29 }
  0xad   :  { %v156_v36 = vadd.f32 %v155_v32, %v136_v34 }
  0xaf   :  { %v175_v37 = vpop.f32.mrf.mxu2  ;;  %v198_v39 = vmax.f32 %v156_v36, 0.0 }
  0xb0   :  { %v176_v40 = vadd.f32 %v175_v37, %v111_v35 }
  0xb1   :  { %252 = vmatmul.f32.vlgmr.msrb.gmra.mxu1 %v198_v39 }
  0xb2   :  { %v196_v41 = vadd.f32 %v195_v38, %v176_v40 }
  0xb4   :  { %v199_v42 = vmax.f32 %v196_v41, 0.0 }
  0xb6   :  { %272 = vmatmul.f32.vlgmr.msrb.gmra.mxu3 %v199_v42 }
 0x12e   :  { %v253_v48 = vpop.f32.mrf.mxu1 }
 0x12f   :  { %v254_v49 = vadd.f32 %v333_v47, %v253_v48 }
 0x139   :  { %v273_v50 = vpop.f32.mrf.mxu3 }
 0x13a   :  { %v274_v51 = vadd.f32 %v273_v50, %v254_v49 }
 0x13c   :  { %v276_v52 = vmax.f32 %v274_v51, 0.0 }
 0x13e   :  { %313 = vmatmul.f32.vlgmr.msrb.gmra.mxu0 %v276_v52 }
 0x1bb   :  { %v314_v54 = vpop.f32.mrf.mxu0 }
 0x1bc   :  { %v315_v55 = vadd.f32 %v334_v53, %v314_v54 }
 0x1be   :  { %318 = vst.msk [vmem:[%s514_s7] sm:$0xff] %vm317_vm1, %v315_v55 }
 0x1bf   :  { %323 = vsyncpa [#allocation3], 1 }
 0x1c0   :  { %324 = vsyncpa [#allocation5], 1 }

</bundles_post_ra>
